<compile_context>
chip_gen: v7x
topology: tpu7x:2x2x1
jax: 0.10.0
libtpu: 0.0.40
codegen_flags: <defaults>
</compile_context>

<pallas_src>
import jax
import jax.numpy as jnp
from jax import lax
from jax.experimental import pallas as pl
from jax.experimental.pallas import tpu as pltpu


# ---------------------------------------------------------------------------
# Kernel bodies
# ---------------------------------------------------------------------------
def _make_kernel(compute_dtype, k_steps):
    """Network computed 'transposed' (features on sublanes, batch on lanes) so
    the 1-wide fc3 emits a lane-dense (1, tb) row block.  Weights arrive
    already cast to compute_dtype (no per-step casts inside the kernel)."""
    cd = compute_dtype

    def _tail(h1_f32, b1, w2, b2, w3, b3_scalar, o_ref):
        # fc1 epilogue + fc2 + fc3 + sigmoid, all in the transposed layout.
        h1 = jnp.maximum(h1_f32 + b1, 0.0)                       # (D, tb) f32
        h2 = jnp.dot(w2, h1.astype(cd),
                     preferred_element_type=jnp.float32)         # (H, tb) MXU
        h2 = jnp.maximum(h2 + b2, 0.0)
        # fc3 (1-wide): VPU multiply + XLU sublane reduce -> lane-dense (1, tb).
        z = jnp.sum(h2 * w3, axis=0, keepdims=True) + b3_scalar
        o_ref[...] = jax.nn.sigmoid(z)                           # EUP exp

    if k_steps == 1:
        # w1 fully resident: single fused step per batch tile, no scratch.
        def mlp_kernel(x_ref, w1_ref, b1_ref, w2_ref, b2_ref, w3_ref, b3_ref,
                       o_ref):
            # fc1 "NT" MXU matmul: h1[d, b] = sum_k w1[d, k] * x[b, k].
            # (If the lowered MLIR ever shows an x-tile relayout here, switch
            #  to pl.dot(w1, x, trans_b=True).)
            h1 = lax.dot_general(
                w1_ref[...], x_ref[...].astype(cd),
                dimension_numbers=(((1,), (1,)), ((), ())),
                preferred_element_type=jnp.float32)              # (D, tb)
            _tail(h1, b1_ref[...], w2_ref[...], b2_ref[...], w3_ref[...],
                  b3_ref[0], o_ref)
        return mlp_kernel

    # K-split over fc1's contraction dim: accumulate h1^T in VMEM scratch and
    # run fc2/fc3 only on the last K step (removes the resident-w1 ceiling).
    def mlp_kernel_ksplit(x_ref, w1_ref, b1_ref, w2_ref, b2_ref, w3_ref,
                          b3_ref, o_ref, acc_ref):
        k = pl.program_id(1)

        @pl.when(k == 0)
        def _():
            acc_ref[...] = jnp.zeros_like(acc_ref)

        acc_ref[...] += lax.dot_general(
            w1_ref[...], x_ref[...].astype(cd),
            dimension_numbers=(((1,), (1,)), ((), ())),
            preferred_element_type=jnp.float32)                  # (D, tb)

        @pl.when(k == k_steps - 1)
        def _():
            _tail(acc_ref[...], b1_ref[...], w2_ref[...], b2_ref[...],
                  w3_ref[...], b3_ref[0], o_ref)

    return mlp_kernel_ksplit


# ---------------------------------------------------------------------------
# Tiling / budgeting heuristics
# ---------------------------------------------------------------------------
def _default_tb(B):
    """Batch tile (lanes of the (1, tb) output block).  Prefer >= 4 batch steps
    (>= 2 per v7x TensorCore) so the x-tile DMA pipelines under compute; among
    those prefer the largest 128-multiple (>=256 feeds the 256-wide MXU)."""
    for t in (512, 256, 128):
        if B % t == 0 and B // t >= 4:
            return t
    for t in (512, 256, 128):
        if B % t == 0 and B // t >= 2:
            return t
    return B


def _default_tk(D, itemsize):
    """fc1 contraction tile.  Keep w1 fully resident while it comfortably fits
    VMEM; otherwise K-split with a 128-multiple tile."""
    if D * D * itemsize <= (12 << 20):
        return D
    for t in (2048, 1024, 512, 256, 128):
        if D % t == 0:
            return t
    # TODO(synk): very large D that is not a multiple of 128 needs w1/x padding.
    return D


def _vmem_capacity_bytes():
    try:
        return int(pltpu.get_tpu_info().vmem_capacity_bytes)
    except Exception:
        return 64 << 20   # conservative: v7x per-TensorCore VMEM (smallest gen)


# ---------------------------------------------------------------------------
# pallas_call builder
# ---------------------------------------------------------------------------
def _forward_impl(x, w1, b1, w2, b2, w3, b3, *, tb, tk, compute_dtype,
                  use_pipeline_modes):
    B, D = x.shape
    H = w2.shape[0]
    nb, nk = B // tb, D // tk
    itemsize = jnp.dtype(compute_dtype).itemsize

    def spec(shape, index_map, bufs=None):
        if use_pipeline_modes and bufs is not None:
            return pl.BlockSpec(shape, index_map,
                                pipeline_mode=pl.Buffered(bufs))
        return pl.BlockSpec(shape, index_map)

    const = lambda i, k: (0, 0)
    in_specs = [
        # x: batch- (and K-) tiled; 3 buffers hide DMA latency when mem-bound.
        spec((tb, tk), lambda i, k: (i, k), bufs=3),
        # w1: resident (constant index) when nk == 1 -> single buffer;
        #     K-tiled (index varies with k) otherwise -> default double buffer.
        spec((D, tk), const if nk == 1 else (lambda i, k: (0, k)),
             bufs=1 if nk == 1 else None),
        spec((D, 1), const, bufs=1),                       # b1 column (f32)
        spec((H, D), const, bufs=1),                       # w2, resident
        spec((H, 1), const, bufs=1),                       # b2 column (f32)
        spec((H, 1), const, bufs=1),                       # w3 = fc3.weight.T
        pl.BlockSpec(memory_space=pltpu.MemorySpace.SMEM),  # b3 scalar in SMEM
    ]
    out_spec = pl.BlockSpec((1, tb), lambda i, k: (0, i))   # lane-dense row

    scratch_shapes = [] if nk == 1 else [pltpu.VMEM((D, tb), jnp.float32)]

    # VMEM budget.  Conservative: assume default double-buffering even where
    # Buffered(1) was requested (in case the request is ignored / falls back).
    weight_block_bytes = (D * tk * itemsize            # w1 block
                          + H * D * itemsize           # w2
                          + (D + 2 * H) * 4)           # b1, b2, w3 (f32)
    vmem_need = (2 * weight_block_bytes
                 + 3 * tb * tk * 4                     # x tiles (f32, <=3 bufs)
                 + 2 * tb * 4                          # (1, tb) output blocks
                 + (0 if nk == 1 else D * tb * 4)      # h1 accumulator scratch
                 + (D + H) * tb * 4                    # h1/h2 temporaries
                 + (2 << 20))                          # misc headroom

    cp_kwargs = dict(dimension_semantics=("parallel", "arbitrary"))
    # v5e's scoped-VMEM default is 16 MiB (v6e/v7x: 32 MiB) -> raise past 16 MiB.
    if vmem_need > (16 << 20):
        # Never request the full physical VMEM: leave ~8 MiB for Mosaic
        # internal scratch, semaphores and output buffers.
        cap = _vmem_capacity_bytes() - (8 << 20)
        cp_kwargs["vmem_limit_bytes"] = int(min(vmem_need, cap))

    cost = pl.CostEstimate(
        flops=2 * B * (D * D + D * H + H),
        transcendentals=B,                               # one exp per sigmoid
        bytes_accessed=(B * D * 4 + B * 4
                        + (D * D + H * D) * itemsize + (D + 2 * H + 1) * 4),
    )

    return pl.pallas_call(
        _make_kernel(compute_dtype, nk),
        out_shape=jax.ShapeDtypeStruct((1, B), jnp.float32),
        grid=(nb, nk),
        in_specs=in_specs,
        out_specs=out_spec,
        scratch_shapes=scratch_shapes,
        compiler_params=pltpu.CompilerParams(**cp_kwargs),
        cost_estimate=cost,
    )(x, w1, b1, w2, b2, w3, b3)


_PIPELINE_MODE_OK = None   # None = untried, True/False once probed


def mynet_forward(x, params, *, tb=None, tk=None, compute_dtype=None):
    """x: (B, D) float32. params: dict from init_params. Returns (B, 1) f32."""
    global _PIPELINE_MODE_OK
    B, D = x.shape

    # bf16 MXU operands (f32 accumulation) once the matmuls are big enough to
    # matter; tiny D stays f32 for exactness.
    if compute_dtype is None:
        compute_dtype = jnp.bfloat16 if D >= 256 else jnp.float32
    itemsize = jnp.dtype(compute_dtype).itemsize

    if tb is None:
        tb = _default_tb(B)
    assert B % tb == 0
    assert tb % 128 == 0 or tb == B, "tb must be a multiple of 128 or equal B"
    if tk is None:
        tk = _default_tk(D, itemsize)
    assert D % tk == 0
    assert tk % 128 == 0 or tk == D, "tk must be a multiple of 128 or equal D"

    # Pre-cast the big weights ONCE in the wrapper: the kernel body runs every
    # grid step, so an in-kernel cast of resident w1/w2 is O(D^2) VPU waste and
    # doubles their HBM/VMEM footprint in bf16 mode.  Biases/w3 stay f32.
    w1c = params["w1"].astype(compute_dtype)
    w2c = params["w2"].astype(compute_dtype)
    args = (x, w1c, params["b1"], w2c, params["b2"], params["w3"], params["b3"])
    kwargs = dict(tb=tb, tk=tk, compute_dtype=compute_dtype)

    # pl.Buffered pipeline modes are a pure VMEM/latency optimization; if this
    # JAX/Mosaic build rejects them, fall back to the default double-buffered
    # pipeline (previously validated configuration).
    if _PIPELINE_MODE_OK is None:
        try:
            out_row = jax.block_until_ready(
                _forward_impl(*args, use_pipeline_modes=True, **kwargs))
            _PIPELINE_MODE_OK = True
            return out_row.reshape(B, 1)
        except Exception:
            _PIPELINE_MODE_OK = False
    out_row = _forward_impl(*args, use_pipeline_modes=_PIPELINE_MODE_OK,
                            **kwargs)
    # (1, B) -> (B, 1): free row-major reshape (no transpose).
    return out_row.reshape(B, 1)


# ---------------------------------------------------------------------------
# Params / reference
# ---------------------------------------------------------------------------
def init_params(key, input_dim):
    """Deterministic init matching MyNet.__init__ shapes.
    nn.Linear(in, out): weight (out, in), bias (out,).
    Stored as: w1 (D,D)=[out,in], b1 (D,1), w2 (H,D), b2 (H,1),
               w3 (H,1)=fc3.weight.T, b3 (1,)."""
    hidden = max(10, input_dim // 2)
    k1, k2, k3, k4, k5, k6 = jax.random.split(key, 6)

    def uinit(k, shape, fan_in):
        bound = 1.0 / (fan_in ** 0.5)
        return jax.random.uniform(k, shape, jnp.float32, -bound, bound)

    return {
        "w1": uinit(k1, (input_dim, input_dim), input_dim),
        "b1": uinit(k2, (input_dim, 1), input_dim),
        "w2": uinit(k3, (hidden, input_dim), input_dim),
        "b2": uinit(k4, (hidden, 1), input_dim),
        "w3": uinit(k5, (hidden, 1), hidden),
        "b3": uinit(k6, (1,), hidden),
    }


def reference_forward(x, p):
    h1 = jnp.maximum(x @ p["w1"].T + p["b1"].T, 0.0)
    h2 = jnp.maximum(h1 @ p["w2"].T + p["b2"].T, 0.0)
    return jax.nn.sigmoid(h2 @ p["w3"] + p["b3"])


# TODO(synk): MyNet.fit / predict / predict_proba (Adam + BCELoss training loop)
# are host-side training utilities, not part of the forward pass kernel.

if __name__ == "__main__":
    key = jax.random.PRNGKey(0)
    kx, kp, kx2, kp2 = jax.random.split(key, 4)

    # 1) Small shape consistent with the module (batch=8, input_dim=32 ->
    #    hidden=16): f32 fused path, single grid step.
    B, D = 8, 32
    x = jax.random.normal(kx, (B, D), jnp.float32)
    params = init_params(kp, D)
    out = jax.block_until_ready(mynet_forward(x, params))
    ref = reference_forward(x, params)
    assert out.shape == (B, 1)
    assert jnp.allclose(out, ref, atol=1e-5, rtol=1e-5), "mismatch (small f32)"

    # 2) Larger batch/dim: exercises bf16 default (D>=256), multi-step
    #    'parallel' batch grid (tb=256, 4 steps) and lane-dense output tiles.
    B2, D2 = 1024, 256
    x2 = jax.random.normal(kx2, (B2, D2), jnp.float32)
    params2 = init_params(kp2, D2)
    out2 = jax.block_until_ready(mynet_forward(x2, params2))
    ref2 = reference_forward(x2, params2)
    assert out2.shape == (B2, 1)
    assert jnp.allclose(out2, ref2, atol=2e-2), "mismatch (large bf16)"

    # 3) Same shape, forced K-split (tk=128 -> 2 K steps) in f32: validates the
    #    'arbitrary' reduction axis + VMEM accumulator path.
    out3 = jax.block_until_ready(
        mynet_forward(x2, params2, tk=128, compute_dtype=jnp.float32))
    assert out3.shape == (B2, 1)
    assert jnp.allclose(out3, ref2, atol=1e-4, rtol=1e-4), "mismatch (K-split)"

    print("KERNEL_OK")
</pallas_src>

<mosaic_0001>
module attributes {stable_mosaic.version = 11 : i64} {
  func.func @mlp_kernel(%arg0: i32, %arg1: i32, %arg2: memref<8x32xf32, #tpu.memory_space<vmem>>, %arg3: memref<32x32xf32, #tpu.memory_space<vmem>>, %arg4: memref<32x1xf32, #tpu.memory_space<vmem>>, %arg5: memref<16x32xf32, #tpu.memory_space<vmem>>, %arg6: memref<16x1xf32, #tpu.memory_space<vmem>>, %arg7: memref<16x1xf32, #tpu.memory_space<vmem>>, %arg8: memref<1xf32, #tpu.memory_space<smem>>, %arg9: memref<1x8xf32, #tpu.memory_space<vmem>>) attributes {dimension_semantics = [#tpu.dimension_semantics<parallel>, #tpu.dimension_semantics<arbitrary>], iteration_bounds = array<i64: 1, 1>, scalar_prefetch = 0 : i64, scratch_operands = 0 : i64, tpu.core_type = #tpu.core_type<tc>, window_params = [{transform_indices = @transform_0, window_bounds = array<i64: 8, 32>}, {pipeline_mode = #tpu.pipeline_mode<synchronous>, transform_indices = @transform_1, window_bounds = array<i64: 32, 32>}, {pipeline_mode = #tpu.pipeline_mode<synchronous>, transform_indices = @transform_2, window_bounds = array<i64: 32, 1>}, {pipeline_mode = #tpu.pipeline_mode<synchronous>, transform_indices = @transform_3, window_bounds = array<i64: 16, 32>}, {pipeline_mode = #tpu.pipeline_mode<synchronous>, transform_indices = @transform_4, window_bounds = array<i64: 16, 1>}, {pipeline_mode = #tpu.pipeline_mode<synchronous>, transform_indices = @transform_5, window_bounds = array<i64: 16, 1>}, {transform_indices = @transform_6, window_bounds = array<i64: 1>}, {transform_indices = @transform_7, window_bounds = array<i64: 1, 8>}]} {
    %c0 = arith.constant 0 : index
    %c0_0 = arith.constant 0 : index
    %0 = vector.load %arg3[%c0, %c0_0] : memref<32x32xf32, #tpu.memory_space<vmem>>, vector<32x32xf32>
    %c0_1 = arith.constant 0 : index
    %c0_2 = arith.constant 0 : index
    %1 = vector.load %arg2[%c0_1, %c0_2] : memref<8x32xf32, #tpu.memory_space<vmem>>, vector<8x32xf32>
    %cst = arith.constant dense<0.000000e+00> : vector<32x8xf32>
    %2 = tpu.matmul %0, %1, %cst {dimension_numbers = #tpu.dot_dimension_numbers<[1], [1], [0], [0], [0, 0, 1, 0], [], []>} : vector<32x32xf32>, vector<8x32xf32>, vector<32x8xf32> -> vector<32x8xf32>
    %c0_3 = arith.constant 0 : index
    %c0_4 = arith.constant 0 : index
    %3 = vector.load %arg4[%c0_3, %c0_4] : memref<32x1xf32, #tpu.memory_space<vmem>>, vector<32x1xf32>
    %c0_5 = arith.constant 0 : index
    %c0_6 = arith.constant 0 : index
    %4 = vector.load %arg5[%c0_5, %c0_6] : memref<16x32xf32, #tpu.memory_space<vmem>>, vector<16x32xf32>
    %c0_7 = arith.constant 0 : index
    %c0_8 = arith.constant 0 : index
    %5 = vector.load %arg6[%c0_7, %c0_8] : memref<16x1xf32, #tpu.memory_space<vmem>>, vector<16x1xf32>
    %c0_9 = arith.constant 0 : index
    %c0_10 = arith.constant 0 : index
    %6 = vector.load %arg7[%c0_9, %c0_10] : memref<16x1xf32, #tpu.memory_space<vmem>>, vector<16x1xf32>
    %c0_11 = arith.constant 0 : index
    %7 = memref.load %arg8[%c0_11] : memref<1xf32, #tpu.memory_space<smem>>
    %8 = vector.broadcast %3 : vector<32x1xf32> to vector<32x8xf32>
    %9 = arith.addf %2, %8 : vector<32x8xf32>
    %cst_12 = arith.constant 0.000000e+00 : f32
    %10 = vector.broadcast %cst_12 : f32 to vector<32x8xf32>
    %11 = arith.maximumf %9, %10 : vector<32x8xf32>
    %cst_13 = arith.constant dense<0.000000e+00> : vector<16x8xf32>
    %12 = tpu.matmul %4, %11, %cst_13 {dimension_numbers = #tpu.dot_dimension_numbers<[1], [0], [0], [1], [0, 0, 1, 1], [], []>} : vector<16x32xf32>, vector<32x8xf32>, vector<16x8xf32> -> vector<16x8xf32>
    %13 = vector.broadcast %5 : vector<16x1xf32> to vector<16x8xf32>
    %14 = arith.addf %12, %13 : vector<16x8xf32>
    %cst_14 = arith.constant 0.000000e+00 : f32
    %15 = vector.broadcast %cst_14 : f32 to vector<16x8xf32>
    %16 = arith.maximumf %14, %15 : vector<16x8xf32>
    %17 = vector.broadcast %6 : vector<16x1xf32> to vector<16x8xf32>
    %18 = arith.mulf %16, %17 : vector<16x8xf32>
    %cst_15 = arith.constant dense<0.000000e+00> : vector<8xf32>
    %19 = vector.multi_reduction <add>, %18, %cst_15 [0] : vector<16x8xf32> to vector<8xf32>
    %20 = vector.shape_cast %19 : vector<8xf32> to vector<1x8xf32>
    %21 = vector.broadcast %7 : f32 to vector<1x8xf32>
    %22 = arith.addf %20, %21 : vector<1x8xf32>
    %23 = arith.negf %22 : vector<1x8xf32>
    %24 = math.exp %23 : vector<1x8xf32>
    %cst_16 = arith.constant 1.000000e+00 : f32
    %25 = vector.broadcast %cst_16 : f32 to vector<1x8xf32>
    %26 = arith.addf %25, %24 : vector<1x8xf32>
    %27 = arith.divf %25, %26 : vector<1x8xf32>
    %c0_17 = arith.constant 0 : index
    %c0_18 = arith.constant 0 : index
    %28 = vector.load %arg9[%c0_17, %c0_18] : memref<1x8xf32, #tpu.memory_space<vmem>>, vector<1x8xf32>
    tpu.vector_store %arg9[%c0_17, %c0_18], %27 {strides = array<i32>} : memref<1x8xf32, #tpu.memory_space<vmem>>, vector<1x8xf32>,
    return
  }
  func.func @transform_0(%arg0: i32, %arg1: i32) -> (i32, i32) {
    %c0_i32 = arith.constant 0 : i32
    return %arg0, %arg1 : i32, i32
  }
  func.func @transform_1(%arg0: i32, %arg1: i32) -> (i32, i32) {
    %c0_i32 = arith.constant 0 : i32
    %c0_i32_0 = arith.constant 0 : i32
    %c0_i32_1 = arith.constant 0 : i32
    return %c0_i32, %c0_i32_0 : i32, i32
  }
  func.func @transform_2(%arg0: i32, %arg1: i32) -> (i32, i32) {
    %c0_i32 = arith.constant 0 : i32
    %c0_i32_0 = arith.constant 0 : i32
    %c0_i32_1 = arith.constant 0 : i32
    return %c0_i32, %c0_i32_0 : i32, i32
  }
  func.func @transform_3(%arg0: i32, %arg1: i32) -> (i32, i32) {
    %c0_i32 = arith.constant 0 : i32
    %c0_i32_0 = arith.constant 0 : i32
    %c0_i32_1 = arith.constant 0 : i32
    return %c0_i32, %c0_i32_0 : i32, i32
  }
  func.func @transform_4(%arg0: i32, %arg1: i32) -> (i32, i32) {
    %c0_i32 = arith.constant 0 : i32
    %c0_i32_0 = arith.constant 0 : i32
    %c0_i32_1 = arith.constant 0 : i32
    return %c0_i32, %c0_i32_0 : i32, i32
  }
  func.func @transform_5(%arg0: i32, %arg1: i32) -> (i32, i32) {
    %c0_i32 = arith.constant 0 : i32
    %c0_i32_0 = arith.constant 0 : i32
    %c0_i32_1 = arith.constant 0 : i32
    return %c0_i32, %c0_i32_0 : i32, i32
  }
  func.func @transform_6(%arg0: i32, %arg1: i32) -> i32 {
    %c0_i32 = arith.constant 0 : i32
    %c0_i32_0 = arith.constant 0 : i32
    return %c0_i32 : i32
  }
  func.func @transform_7(%arg0: i32, %arg1: i32) -> (i32, i32) {
    %c0_i32 = arith.constant 0 : i32
    %c0_i32_0 = arith.constant 0 : i32
    return %c0_i32, %arg0 : i32, i32
  }
}

</mosaic_0001>

<bundles_post_ra>
// kernel: tpu_custom_call.1
= control target key start
LH: loop header
LB: loop body
LE: loop exit
PB: predicated region body
PF: predicated region fallthrough
CT: control target
= control target key end

     0   :  { %vm64_vm0 = vcmask 261120   ;;  %v386_v4 = vmov 0   ;;  %s496_s0 = inlined_call_operand.vmem [shape: f32[8,32], index: 0, kind: input, shape index: {}]   ;;  %s497_s1 = inlined_call_operand.vmem [shape: f32[32,32], index: 1, kind: input, shape index: {}]   ;;  %s498_s2 = inlined_call_operand.vmem [shape: f32[32,1], index: 2, kind: input, shape index: {}]   ;;  %s499_s3 = inlined_call_operand.vmem [shape: f32[16,32], index: 3, kind: input, shape index: {}]   ;;  %s500_s4 = inlined_call_operand.vmem [shape: f32[16,1], index: 4, kind: input, shape index: {}]   ;;  %s501_s5 = inlined_call_operand.vmem [shape: f32[16,1], index: 5, kind: input, shape index: {}]   ;;  %s502_s6 = inlined_call_operand.<no memory space> [shape: f32[1], index: 6, kind: input, shape index: {}]   ;;  %s503_s7 = inlined_call_operand.hbm [shape: f32[1,8], index: 7, kind: output, shape index: {}]  }
   0x1   :  { %v32_v0 = vld [vmem:[%s496_s0] sm:$0xff]  ;;  %v29_v3 = vld [vmem:[%s497_s1 + $0x8] sm:$0xff]  ;;  %356 = vset.pattern.permute.xlu0 %v386_v4  ;;  %v35_v5 = vld [vmem:[%s498_s2 + $0x10] sm:$0xff]  ;;  %357 = vset.pattern.permute.xlu1 %v386_v4 }
   0x2   :  { %v28_v1 = vld [vmem:[%s497_s1] sm:$0xff]  ;;  %327 = vmatprep.subr.msk.mxu0 %vm64_vm0, %v32_v0  ;;  %v30_v6 = vld [vmem:[%s497_s1 + $0x10] sm:$0xff]  ;;  %56 = vperm.xlu1 %357, %v35_v5   ;;  %v34_v7 = vld [vmem:[%s498_s2 + $0x8] sm:$0xff] }
   0x3   :  { %329 = vmatprep.mubr.msk.f32.mxu0 %vm64_vm0, %v28_v1  ;;  %v33_v2 = vld [vmem:[%s498_s2] sm:$0xff]  ;;  %328 = vmatpush3.xpose.msk.msra.mxu0 %vm64_vm0, %v32_v0 }
   0x4   :  { %46 = vperm.xlu0 %356, %v33_v2  }
   0x5   :  { %13 = vsyncpa [#allocation4], 0  ;;  %v36_v8 = vld [vmem:[%s498_s2 + $0x18] sm:$0xff]  ;;  %v39_v10 = vld [vmem:[%s500_s4] sm:$0xff]  ;;  %vm274_vm1 = vcmask 64512   ;;  %v284_v54 = vstv %s502_s6  ;;  %s387_s27 = smov [#allocation3]  }
   0x6   :  { %330 = vmatmul.mubr.msk.f32.vlgmr.msra.gmra.mrb[0].mxu0 %vm64_vm0, %v29_v3  ;;  %v31_v9 = vld [vmem:[%s497_s1 + $0x18] sm:$0xff]  ;;  %61 = vperm.xlu1 %357, %v36_v8   ;;  %v40_v11 = vld [vmem:[%s500_s4 + $0x8] sm:$0xff]  ;;  %v41_v12 = vld [vmem:[%s501_s5] sm:$0xff]  ;;  %s300_s28 = sshll.u32 %s387_s27, 4  ;;  %vm292_vm2 = vcmask 57344   ;;  %s301_s28 = int_to_ptr.vmem [resolvable:$true] %s300_s28 }
   0x7   :  { %332 = vmatprep.mubr.msk.f32.mxu0 %vm64_vm0, %v30_v6  ;;  %v42_v13 = vld [vmem:[%s501_s5 + $0x8] sm:$0xff]  ;;  %v37_v14 = vld [vmem:[%s499_s3] sm:$0xff]  ;;  %s362_s29 = scalar_lea.vmem %s301_s28, 16  ;;  %s366_s30 = scalar_lea.vmem %s301_s28, 32 }
   0x8   :  { %51 = vperm.xlu0 %356, %v34_v7   ;;  %343 = vmatprep.mubr.msk.f32.mxu1 %vm64_vm0, %v37_v14  ;;  %v38_v33 = vld [vmem:[%s499_s3 + $0x8] sm:$0xff]  ;;  %p363_p0 = scmp.ne.s32.totalorder %s301_s28, %s362_s29  ;;  %p367_p1 = scmp.lt.s32.totalorder %s301_s28, %s301_s28 }
   0x9   :  { %p368_p2 = scmp.lt.s32.totalorder %s366_s30, %s362_s29 }
   0xa   :  { %333 = vmatmul.mubr.msk.f32.gmra.mrb[2].mxu0 %vm64_vm0, %v31_v9  ;;  %176 = vperm.xlu1 %357, %v40_v11  }
   0xb   :  { %p369_p3 = por %p368_p2, %p367_p1 }
   0xc   :  { %171 = vperm.xlu0 %356, %v39_v10  }
   0xd   :  { %p370_p4 = pnand %p369_p3, %p363_p0 }
   0xe   :  { %269 = vperm.xlu1 %357, %v42_v13  }
  0x10   :  { %264 = vperm.xlu0 %356, %v41_v12  }
  0x81   :  { %v57_v16 = vpop.permute.xlu1 %56 }
  0x83   :  { %v47_v15 = vpop.permute.xlu0 %46 }
  0x85   :  { %v62_v23 = vpop.permute.xlu1 %61 }
  0x87   :  { %v52_v17 = vpop.permute.xlu0 %51 }
  0x89   :  { %v177_v34 = vpop.permute.xlu1 %176 }
  0x8b   :  { %v172_v35 = vpop.permute.xlu0 %171 }
  0x8d   :  { %v270_v41 = vpop.permute.xlu1 %269 }
  0x8f   :  { %v265_v43 = vpop.permute.xlu0 %264 }
  0xd9   :  { %v331_v18 = vpop.f32.mrb[0].mxu0 }
  0xda   :  { %v152_v19 = vadd.f32 %v331_v18, %v52_v17  ;;  %v146_v20 = vpop.f32.mrb[1].mxu0 }
  0xdb   :  { %v147_v21 = vadd.f32 %v146_v20, %v47_v15 }
  0xdc   :  { %v166_v22 = vmax.f32 %v152_v19, 0.0 }
  0xdd   :  { %v165_v24 = vmax.f32 %v147_v21, 0.0  ;;  %v334_v25 = vpop.f32.mrb[2].mxu0 }
  0xde   :  { %v162_v26 = vadd.f32 %v334_v25, %v62_v23  ;;  %v156_v27 = vpop.f32.mrb[3].mxu0 }
  0xdf   :  { %v157_v28 = vadd.f32 %v156_v27, %v57_v16  ;;  %v346_v29 = vpack.c.bf16 %v166_v22, %v165_v24 }
  0xe0   :  { %v168_v30 = vmax.f32 %v162_v26, 0.0 }
  0xe1   :  { %v167_v31 = vmax.f32 %v157_v28, 0.0  ;;  %347 = vmatprep.subr.bf16.mxu1 %v346_v29 }
  0xe2   :  { %349 = vmatpush3.bf16.msra.mxu1 %v346_v29 }
  0xe3   :  { %v350_v32 = vpack.c.bf16 %v168_v30, %v167_v31 }
  0xe5   :  { %351 = vmatprep.subr.bf16.mxu1 %v350_v32 }
  0xe6   :  { %353 = vmatpush3.bf16.msra.mxu1 %v350_v32 }
  0xe9   :  { %344 = vmatmul.mubr.msk.f32.vlgmr.msra.gmra.mrb[0].mxu1 %vm64_vm0, %v38_v33 }
 0x1bc   :  { %v345_v36 = vpop.f32.mrb[0].mxu1 }
 0x1bd   :  { %v257_v37 = vadd.f32 %v345_v36, %v177_v34  ;;  %v251_v38 = vpop.f32.mrb[1].mxu1 }
 0x1be   :  { %v252_v39 = vadd.f32 %v251_v38, %v172_v35 }
 0x1bf   :  { %v261_v40 = vmax.f32 %v257_v37, 0.0 }
 0x1c0   :  { %v260_v42 = vmax.f32 %v252_v39, 0.0 }
 0x1c1   :  { %v273_v44 = vmul.f32 %v270_v41, %v261_v40 }
 0x1c2   :  { %v272_v45 = vmul.f32 %v265_v43, %v260_v42 }
 0x1c3   :  { %v276_v46 = vsel %vm274_vm1, %v273_v44, 0.0 }
 0x1c4   :  { %v275_v47 = vsel %vm274_vm1, %v272_v45, 0.0 }
 0x1c5   :  { %v277_v48 = vadd.f32 %v276_v46, %v275_v47 }
 0x1c7   :  { %v278_v49 = vrot.slane %v277_v48, 4 }
 0x1c9   :  { %v279_v50 = vadd.f32 %v278_v49, %v277_v48 }
 0x1cb   :  { %v280_v51 = vrot.slane %v279_v50, 2 }
 0x1cd   :  { %v281_v52 = vadd.f32 %v280_v51, %v279_v50 }
 0x1cf   :  { %v282_v53 = vrot.slane %v281_v52, 1 }
 0x1d1   :  { %v283_v55 = vadd.f32 %v282_v53, %v281_v52 }
 0x1d3   :  { %v285_v56 = vadd.f32 %v284_v54, %v283_v55 }
 0x1d5   :  { %v315_v57 = vmul.f32 -1.442695, %v285_v56 }
 0x1d7   :  { %358 = vpow2.f32 %v315_v57 }
 0x1e1   :  { %v359_v58 = vpop.eup %358 }
 0x1e2   :  { %v289_v59 = vadd.f32 1.0, %v359_v58 }
 0x1e4   :  { %360 = vrcp.f32 %v289_v59 }
 0x1ee   :  { %v361_v60 = vpop.eup %360 }
 0x1ef   :  { %293 = vst.msk [vmem:[#allocation3] sm:$0x1] %vm292_vm2, %v361_v60 }
 0x1f0   :  { %373 = shalt.err (!%p370_p4)
}
 0x1f1   :  { %s374_s0 = scalar_lea.hbm %s503_s7, 16 }
 0x1f2   :  { %p375_p5 = scmp.ne.s32.totalorder %s503_s7, %s374_s0  ;;  %p378_p6 = scmp.lt.u32.totalorder %s374_s0, %s503_s7 }
 0x1f4   :  { %p380_p7 = pnand %p378_p6, %p375_p5 }
 0x1f6   :  { %383 = shalt.err (!%p380_p7)
}
 0x1f7   :  { %303 = dma.vmem_to_hbm [thread:$0]  %s301_s28, 16, %s503_s7, [#allocation4]  }
 0x1f8   :  { %384 = dma.done.wait [#allocation4], 16  }
 0x1f9   :  { %385 = vsyncadd [#allocation4], 4294967280 }
 0x1fa   :  { %307 = vsyncpa [#allocation4], 1 }

</bundles_post_ra>
